<compile_context>
chip_gen: v5e
topology: v5e:2x2
jax: 0.10.0
libtpu: 0.0.40
codegen_flags: <defaults>
</compile_context>

<pallas_src>
import functools
from collections.abc import Mapping

import numpy as np

import jax
import jax.numpy as jnp
from jax.experimental import pallas as pl
from jax.experimental.pallas import tpu as pltpu


_LANES = 128
_GROUP = 32                      # accumulator rows; breaks the serial add chain
_SLAB_ROW_ALIGN = 256            # keeps (rows//GROUP, GROUP) scale blocks sublane aligned
_TARGET_BLOCK_BYTES = 4 * 1024 * 1024   # >=4 MiB data blocks -> ~95% of HBM roofline
_SPLITS = 2                      # leading "parallel" grid axis (2 TCs on v7x)
_DIRECT_MIN_ROWS = 256           # params with >= 256 full 128-lane rows stream in place
_VMEM_LIMIT_BYTES = 48 * 1024 * 1024


def _round_up(x, m):
    return -(-x // m) * m


def _target_block_rows(itemsize):
    return max(_TARGET_BLOCK_BYTES // (_LANES * max(int(itemsize), 1)), _SLAB_ROW_ALIGN)


# ---------------------------------------------------------------------------
# Kernels
# ---------------------------------------------------------------------------

def _slab_kernel(cur_ref, ori_ref, scale_ref, out_ref):
    """Packed path: sum(scale_row * (cur - ori)^2) into a resident (1,G,128) block."""
    @pl.when(pl.program_id(1) == 0)
    def _init():
        out_ref[...] = jnp.zeros_like(out_ref)

    d = cur_ref[...].astype(jnp.float32) - ori_ref[...].astype(jnp.float32)
    w = (d * d).reshape(-1, _GROUP, _LANES)            # (B//G, G, 128)
    sc = scale_ref[...]                                # (B//G, G) per-row 1/numel
    out_ref[...] += (w * sc[:, :, None]).sum(axis=0, keepdims=True)


def _param_kernel(cur_ref, ori_ref, out_ref, *, block_rows, steps, total_rows, masked):
    """Direct path: sum((cur - ori)^2) over one param streamed in place."""
    @pl.when(pl.program_id(1) == 0)
    def _init():
        out_ref[...] = jnp.zeros_like(out_ref)

    d = cur_ref[...].astype(jnp.float32) - ori_ref[...].astype(jnp.float32)
    w = d * d
    if masked:  # static: last block is padded (and a trailing block may be clamped)
        b = pl.program_id(0) * steps + pl.program_id(1)
        row = b * block_rows + jax.lax.broadcasted_iota(jnp.int32, (block_rows, 1), 0)
        w = jnp.where(row < total_rows, w, 0.0)
    out_ref[...] += w.reshape(-1, _GROUP, _LANES).sum(axis=0, keepdims=True)


# ---------------------------------------------------------------------------
# Geometry + pallas_call builders
# ---------------------------------------------------------------------------

def _slab_geometry(row_counts, itemsize):
    total = max(sum(row_counts), 1)
    half = -(-total // _SPLITS)
    block_rows = min(_target_block_rows(itemsize), _round_up(half, _SLAB_ROW_ALIGN))
    steps = -(-half // block_rows)
    rows = _SPLITS * steps * block_rows
    return block_rows, steps, rows


def _make_slab_call(block_rows, steps):
    data_spec = pl.BlockSpec((block_rows, _LANES), lambda c, i: (c * steps + i, 0))
    scale_spec = pl.BlockSpec((block_rows // _GROUP, _GROUP),
                              lambda c, i: (c * steps + i, 0))
    out_spec = pl.BlockSpec((1, _GROUP, _LANES), lambda c, i: (c, 0, 0))
    return pl.pallas_call(
        _slab_kernel,
        out_shape=jax.ShapeDtypeStruct((_SPLITS, _GROUP, _LANES), jnp.float32),
        grid=(_SPLITS, steps),
        in_specs=[data_spec, data_spec, scale_spec],
        out_specs=out_spec,
        compiler_params=pltpu.CompilerParams(
            dimension_semantics=("parallel", "arbitrary"),
            vmem_limit_bytes=_VMEM_LIMIT_BYTES),
    )


def _make_param_call(rows_p, itemsize):
    block_rows = min(_target_block_rows(itemsize),
                     _round_up(-(-rows_p // _SPLITS), _GROUP))
    blocks_total = -(-rows_p // block_rows)
    steps = -(-blocks_total // _SPLITS)
    masked = (_SPLITS * steps * block_rows) != rows_p

    kernel = functools.partial(_param_kernel, block_rows=block_rows, steps=steps,
                               total_rows=rows_p, masked=masked)

    def data_idx(c, i):
        # Clamp a possible fully-out-of-range trailing block; the kernel mask
        # (driven by the UNclamped flat index) zeroes its contribution.
        return (jnp.minimum(c * steps + i, blocks_total - 1), 0)

    data_spec = pl.BlockSpec((block_rows, _LANES), data_idx)
    out_spec = pl.BlockSpec((1, _GROUP, _LANES), lambda c, i: (c, 0, 0))
    return pl.pallas_call(
        kernel,
        out_shape=jax.ShapeDtypeStruct((_SPLITS, _GROUP, _LANES), jnp.float32),
        grid=(_SPLITS, steps),
        in_specs=[data_spec, data_spec],
        out_specs=out_spec,
        compiler_params=pltpu.CompilerParams(
            dimension_semantics=("parallel", "arbitrary"),
            vmem_limit_bytes=_VMEM_LIMIT_BYTES),
    )


# ---------------------------------------------------------------------------
# Packing helpers (packed path only)
# ---------------------------------------------------------------------------

def _pack_params(params, rows, dtype):
    """Flatten each param, pad to whole 128-lane rows, concatenate, pad to `rows`."""
    parts = []
    for p in params:
        flat = jnp.asarray(p).reshape(-1).astype(dtype)
        n = flat.shape[0]
        nr = max(-(-n // _LANES), 1)
        parts.append(jnp.pad(flat, (0, nr * _LANES - n)))
    packed = jnp.concatenate(parts) if len(parts) > 1 else parts[0]
    packed = jnp.pad(packed, (0, rows * _LANES - packed.shape[0]))
    return packed.reshape(rows, _LANES)


def _build_scale(shapes, rows):
    """Per-row 1/numel (0 for tail padding rows), stored lane-compact (rows//G, G)."""
    s = np.zeros((rows,), np.float32)
    r = 0
    for shp in shapes:
        n = max(int(np.prod(shp)), 1)
        nr = -(-n // _LANES)
        s[r:r + nr] = 1.0 / n
        r += nr
    return jnp.asarray(s.reshape(rows // _GROUP, _GROUP))


# ---------------------------------------------------------------------------
# Module
# ---------------------------------------------------------------------------

class L2SPLoss:
    """JAX/Pallas port of the PyTorch L2_SP_Loss module.

    loss(weight_cur) = sum_p mean((weight_cur[p] - weight_ori[p])**2)
    """

    def __init__(self, weight_ori):
        if isinstance(weight_ori, Mapping):
            self._keys = list(weight_ori.keys())
            ori_params = [jnp.asarray(weight_ori[k]) for k in self._keys]
        else:
            ori_params = [jnp.asarray(p) for p in weight_ori]
            self._keys = list(range(len(ori_params)))
        self._shapes = [tuple(p.shape) for p in ori_params]
        self._n_params = len(ori_params)

        # Partition params: large lane-aligned tensors stream in place (direct),
        # small / ragged tensors are fused into one packed slab.
        self._direct_idx, self._packed_idx = [], []
        for i, p in enumerate(ori_params):
            n = int(np.prod(p.shape))
            if n % _LANES == 0 and n >= _LANES * _DIRECT_MIN_ROWS:
                self._direct_idx.append(i)
            else:
                self._packed_idx.append(i)

        # --- direct path ---
        self._direct_calls, self._direct_inv, ori_direct = [], [], []
        for i in self._direct_idx:
            p = ori_params[i]
            n = int(np.prod(p.shape))
            rows_p = n // _LANES
            self._direct_calls.append(_make_param_call(rows_p, p.dtype.itemsize))
            self._direct_inv.append(1.0 / n)
            ori_direct.append(p.reshape(rows_p, _LANES))
        self._ori_direct = tuple(ori_direct)

        # --- packed path ---
        if self._packed_idx:
            packed_ori = [ori_params[i] for i in self._packed_idx]
            packed_shapes = [self._shapes[i] for i in self._packed_idx]
            dt = jnp.result_type(*[p.dtype for p in packed_ori])
            if not jnp.issubdtype(dt, jnp.floating):
                dt = jnp.dtype(jnp.float32)
            self._slab_dtype = jnp.dtype(dt)
            row_counts = [-(-max(int(np.prod(s)), 1) // _LANES) for s in packed_shapes]
            block_rows, steps, rows = _slab_geometry(row_counts, self._slab_dtype.itemsize)
            self._rows = rows
            self._ori_slab = _pack_params(packed_ori, rows, self._slab_dtype)
            self._scale = _build_scale(packed_shapes, rows)
            self._slab_call = _make_slab_call(block_rows, steps)
        else:
            self._slab_dtype = jnp.dtype(jnp.float32)
            self._rows = 0
            self._ori_slab = ()
            self._scale = ()
            self._slab_call = None

        has_packed = bool(self._packed_idx)
        direct_calls = tuple(self._direct_calls)
        direct_inv = tuple(self._direct_inv)
        slab_call = self._slab_call
        slab_dtype = self._slab_dtype
        rows = self._rows

        def _loss(cur_direct, cur_packed, ori_direct, ori_slab, scale):
            total = jnp.zeros((), jnp.float32)
            # Large params: zero-copy (rows, 128) view, streamed straight from HBM.
            for cp, op, call, inv_n in zip(cur_direct, ori_direct, direct_calls, direct_inv):
                part = call(cp.reshape(op.shape), op)      # (SPLITS, G, 128) f32
                total = total + jnp.sum(part) * inv_n
            if has_packed:
                # Promote so current weights are never downcast before differencing.
                cur_dt = jnp.promote_types(slab_dtype,
                                           jnp.result_type(*[c.dtype for c in cur_packed]))
                if not jnp.issubdtype(cur_dt, jnp.floating):
                    cur_dt = jnp.dtype(jnp.float32)
                # TODO(synk): small/ragged params still take one fused pad+concat copy;
                # a fully zero-copy variant would stream them via pl.ANY + manual DMA.
                cur_slab = _pack_params(cur_packed, rows, cur_dt)
                total = total + jnp.sum(slab_call(cur_slab, ori_slab, scale))
            return total

        self._loss = jax.jit(_loss)

    def __call__(self, weight_cur):
        if isinstance(weight_cur, Mapping):
            if set(weight_cur.keys()) >= set(self._keys):
                cur = [weight_cur[k] for k in self._keys]
            else:
                cur = list(weight_cur.values())
        else:
            cur = list(weight_cur)

        if self._n_params == 0 or not cur:
            return jnp.zeros((), jnp.float32)
        if len(cur) != self._n_params:
            raise ValueError(
                f"L2SPLoss: got {len(cur)} current tensors, expected {self._n_params}")
        cur = [jnp.asarray(c) for c in cur]
        for k, (c, s) in enumerate(zip(cur, self._shapes)):
            if tuple(c.shape) != s:
                raise ValueError(
                    f"L2SPLoss: param {self._keys[k]!r} has shape {tuple(c.shape)}, expected {s}")

        cur_direct = tuple(cur[i] for i in self._direct_idx)
        cur_packed = tuple(cur[i] for i in self._packed_idx)
        return self._loss(cur_direct, cur_packed, self._ori_direct,
                          self._ori_slab, self._scale)


def l2_sp_loss(weight_ori, weight_cur):
    """One-shot convenience mirroring L2_SP_Loss(weight_ori)(weight_cur)."""
    return L2SPLoss(weight_ori)(weight_cur)


if __name__ == "__main__":
    key = jax.random.PRNGKey(0)
    k1, k2, k3, k4, k5, k6 = jax.random.split(key, 6)

    # Deterministic synthetic "pretrained" weights (PyTorch-style shapes):
    # one medium embedding (exercises the in-place streaming path) plus small
    # conv / linear weights & biases (exercise the packed-slab path).
    weight_ori = {
        "embed.weight": jax.random.normal(k1, (256, 128), dtype=jnp.float32),
        "conv.weight": jax.random.normal(k2, (4, 4, 3, 3), dtype=jnp.float32),
        "conv.bias": jax.random.normal(k3, (4,), dtype=jnp.float32),
        "fc.weight": jax.random.normal(k4, (32, 16), dtype=jnp.float32),
        "fc.bias": jax.random.normal(k5, (32,), dtype=jnp.float32),
    }

    # Current weights = original + small deterministic perturbation.
    pert_keys = jax.random.split(k6, len(weight_ori))
    weight_cur = {
        k: w + 0.05 * jax.random.normal(pk, w.shape, dtype=w.dtype)
        for (k, w), pk in zip(weight_ori.items(), pert_keys)
    }

    loss_mod = L2SPLoss(weight_ori)          # packs frozen small weights + scales once
    loss = jax.block_until_ready(loss_mod(weight_cur))

    # Pure-JAX reference (mean-of-squares per param, summed).
    ref = sum(
        jnp.mean((weight_cur[k] - weight_ori[k]) ** 2) for k in weight_ori
    )
    assert jnp.allclose(loss, ref, rtol=1e-5, atol=1e-6), (loss, ref)

    # Also exercise the list-of-tensors calling convention (PyTorch parity).
    loss_list = jax.block_until_ready(loss_mod(list(weight_cur.values())))
    assert jnp.allclose(loss_list, ref, rtol=1e-5, atol=1e-6), (loss_list, ref)

    print("KERNEL_OK")
</pallas_src>

<mosaic_0001>
module attributes {stable_mosaic.version = 11 : i64} {
  func.func @_slab_kernel(%arg0: i32, %arg1: i32, %arg2: memref<256x128xf32, #tpu.memory_space<vmem>>, %arg3: memref<256x128xf32, #tpu.memory_space<vmem>>, %arg4: memref<8x32xf32, #tpu.memory_space<vmem>>, %arg5: memref<1x32x128xf32, #tpu.memory_space<vmem>>) attributes {dimension_semantics = [#tpu.dimension_semantics<parallel>, #tpu.dimension_semantics<arbitrary>], iteration_bounds = array<i64: 2, 1>, scalar_prefetch = 0 : i64, scratch_operands = 0 : i64, tpu.core_type = #tpu.core_type<tc>, window_params = [{transform_indices = @transform_0, window_bounds = array<i64: 256, 128>}, {transform_indices = @transform_1, window_bounds = array<i64: 256, 128>}, {transform_indices = @transform_2, window_bounds = array<i64: 8, 32>}, {transform_indices = @transform_3, window_bounds = array<i64: 1, 32, 128>}]} {
    %c0_i32 = arith.constant 0 : i32
    %0 = arith.cmpi eq, %arg1, %c0_i32 : i32
    %1 = arith.extui %0 : i1 to i32
    %c0_i32_0 = arith.constant 0 : i32
    %2 = arith.cmpi ne, %1, %c0_i32_0 : i32
    scf.if %2 {
      %cst_12 = arith.constant 0.000000e+00 : f32
      %17 = vector.broadcast %cst_12 : f32 to vector<1x32x128xf32>
      %c0_13 = arith.constant 0 : index
      %c0_14 = arith.constant 0 : index
      %c0_15 = arith.constant 0 : index
      %18 = vector.load %arg5[%c0_13, %c0_14, %c0_15] : memref<1x32x128xf32, #tpu.memory_space<vmem>>, vector<1x32x128xf32>
      tpu.vector_store %arg5[%c0_13, %c0_14, %c0_15], %17 {strides = array<i32>} : memref<1x32x128xf32, #tpu.memory_space<vmem>>, vector<1x32x128xf32>,
    } else {
    }
    %c0 = arith.constant 0 : index
    %c0_1 = arith.constant 0 : index
    %3 = vector.load %arg2[%c0, %c0_1] : memref<256x128xf32, #tpu.memory_space<vmem>>, vector<256x128xf32>
    %c0_2 = arith.constant 0 : index
    %c0_3 = arith.constant 0 : index
    %4 = vector.load %arg3[%c0_2, %c0_3] : memref<256x128xf32, #tpu.memory_space<vmem>>, vector<256x128xf32>
    %5 = arith.subf %3, %4 : vector<256x128xf32>
    %6 = arith.mulf %5, %5 : vector<256x128xf32>
    %7 = vector.shape_cast %6 : vector<256x128xf32> to vector<8x32x128xf32>
    %c0_4 = arith.constant 0 : index
    %c0_5 = arith.constant 0 : index
    %8 = vector.load %arg4[%c0_4, %c0_5] : memref<8x32xf32, #tpu.memory_space<vmem>>, vector<8x32xf32>
    %c0_6 = arith.constant 0 : index
    %c0_7 = arith.constant 0 : index
    %c0_8 = arith.constant 0 : index
    %9 = vector.load %arg5[%c0_6, %c0_7, %c0_8] : memref<1x32x128xf32, #tpu.memory_space<vmem>>, vector<1x32x128xf32>
    %10 = vector.shape_cast %8 : vector<8x32xf32> to vector<8x32x1xf32>
    %11 = vector.broadcast %10 : vector<8x32x1xf32> to vector<8x32x128xf32>
    %12 = arith.mulf %7, %11 : vector<8x32x128xf32>
    %cst = arith.constant dense<0.000000e+00> : vector<32x128xf32>
    %13 = vector.multi_reduction <add>, %12, %cst [0] : vector<8x32x128xf32> to vector<32x128xf32>
    %14 = vector.shape_cast %13 : vector<32x128xf32> to vector<1x32x128xf32>
    %15 = arith.addf %9, %14 : vector<1x32x128xf32>
    %c0_9 = arith.constant 0 : index
    %c0_10 = arith.constant 0 : index
    %c0_11 = arith.constant 0 : index
    %16 = vector.load %arg5[%c0_9, %c0_10, %c0_11] : memref<1x32x128xf32, #tpu.memory_space<vmem>>, vector<1x32x128xf32>
    tpu.vector_store %arg5[%c0_9, %c0_10, %c0_11], %15 {strides = array<i32>} : memref<1x32x128xf32, #tpu.memory_space<vmem>>, vector<1x32x128xf32>,
    return
  }
  func.func @transform_0(%arg0: i32, %arg1: i32) -> (i32, i32) {
    %c1_i32 = arith.constant 1 : i32
    %0 = arith.muli %arg0, %c1_i32 : i32
    %1 = arith.addi %0, %arg1 : i32
    %c0_i32 = arith.constant 0 : i32
    %c0_i32_0 = arith.constant 0 : i32
    return %1, %c0_i32 : i32, i32
  }
  func.func @transform_1(%arg0: i32, %arg1: i32) -> (i32, i32) {
    %c1_i32 = arith.constant 1 : i32
    %0 = arith.muli %arg0, %c1_i32 : i32
    %1 = arith.addi %0, %arg1 : i32
    %c0_i32 = arith.constant 0 : i32
    %c0_i32_0 = arith.constant 0 : i32
    return %1, %c0_i32 : i32, i32
  }
  func.func @transform_2(%arg0: i32, %arg1: i32) -> (i32, i32) {
    %c1_i32 = arith.constant 1 : i32
    %0 = arith.muli %arg0, %c1_i32 : i32
    %1 = arith.addi %0, %arg1 : i32
    %c0_i32 = arith.constant 0 : i32
    %c0_i32_0 = arith.constant 0 : i32
    return %1, %c0_i32 : i32, i32
  }
  func.func @transform_3(%arg0: i32, %arg1: i32) -> (i32, i32, i32) {
    %c0_i32 = arith.constant 0 : i32
    %c0_i32_0 = arith.constant 0 : i32
    %c0_i32_1 = arith.constant 0 : i32
    return %arg0, %c0_i32, %c0_i32_0 : i32, i32, i32
  }
}

module attributes {stable_mosaic.version = 11 : i64} {
  func.func @_param_kernel(%arg0: i32, %arg1: i32, %arg2: memref<128x128xf32, #tpu.memory_space<vmem>>, %arg3: memref<128x128xf32, #tpu.memory_space<vmem>>, %arg4: memref<1x32x128xf32, #tpu.memory_space<vmem>>) attributes {dimension_semantics = [#tpu.dimension_semantics<parallel>, #tpu.dimension_semantics<arbitrary>], iteration_bounds = array<i64: 2, 1>, scalar_prefetch = 0 : i64, scratch_operands = 0 : i64, tpu.core_type = #tpu.core_type<tc>, window_params = [{transform_indices = @transform_0, window_bounds = array<i64: 128, 128>}, {transform_indices = @transform_1, window_bounds = array<i64: 128, 128>}, {transform_indices = @transform_2, window_bounds = array<i64: 1, 32, 128>}]} {
    %c0_i32 = arith.constant 0 : i32
    %0 = arith.cmpi eq, %arg1, %c0_i32 : i32
    %1 = arith.extui %0 : i1 to i32
    %c0_i32_0 = arith.constant 0 : i32
    %2 = arith.cmpi ne, %1, %c0_i32_0 : i32
    scf.if %2 {
      %cst_10 = arith.constant 0.000000e+00 : f32
      %13 = vector.broadcast %cst_10 : f32 to vector<1x32x128xf32>
      %c0_11 = arith.constant 0 : index
      %c0_12 = arith.constant 0 : index
      %c0_13 = arith.constant 0 : index
      %14 = vector.load %arg4[%c0_11, %c0_12, %c0_13] : memref<1x32x128xf32, #tpu.memory_space<vmem>>, vector<1x32x128xf32>
      tpu.vector_store %arg4[%c0_11, %c0_12, %c0_13], %13 {strides = array<i32>} : memref<1x32x128xf32, #tpu.memory_space<vmem>>, vector<1x32x128xf32>,
    } else {
    }
    %c0 = arith.constant 0 : index
    %c0_1 = arith.constant 0 : index
    %3 = vector.load %arg2[%c0, %c0_1] : memref<128x128xf32, #tpu.memory_space<vmem>>, vector<128x128xf32>
    %c0_2 = arith.constant 0 : index
    %c0_3 = arith.constant 0 : index
    %4 = vector.load %arg3[%c0_2, %c0_3] : memref<128x128xf32, #tpu.memory_space<vmem>>, vector<128x128xf32>
    %5 = arith.subf %3, %4 : vector<128x128xf32>
    %6 = arith.mulf %5, %5 : vector<128x128xf32>
    %c0_4 = arith.constant 0 : index
    %c0_5 = arith.constant 0 : index
    %c0_6 = arith.constant 0 : index
    %7 = vector.load %arg4[%c0_4, %c0_5, %c0_6] : memref<1x32x128xf32, #tpu.memory_space<vmem>>, vector<1x32x128xf32>
    %8 = vector.shape_cast %6 : vector<128x128xf32> to vector<4x32x128xf32>
    %cst = arith.constant dense<0.000000e+00> : vector<32x128xf32>
    %9 = vector.multi_reduction <add>, %8, %cst [0] : vector<4x32x128xf32> to vector<32x128xf32>
    %10 = vector.shape_cast %9 : vector<32x128xf32> to vector<1x32x128xf32>
    %11 = arith.addf %7, %10 : vector<1x32x128xf32>
    %c0_7 = arith.constant 0 : index
    %c0_8 = arith.constant 0 : index
    %c0_9 = arith.constant 0 : index
    %12 = vector.load %arg4[%c0_7, %c0_8, %c0_9] : memref<1x32x128xf32, #tpu.memory_space<vmem>>, vector<1x32x128xf32>
    tpu.vector_store %arg4[%c0_7, %c0_8, %c0_9], %11 {strides = array<i32>} : memref<1x32x128xf32, #tpu.memory_space<vmem>>, vector<1x32x128xf32>,
    return
  }
  func.func @transform_0(%arg0: i32, %arg1: i32) -> (i32, i32) {
    %c1_i32 = arith.constant 1 : i32
    %0 = arith.muli %arg0, %c1_i32 : i32
    %1 = arith.addi %0, %arg1 : i32
    %c1_i32_0 = arith.constant 1 : i32
    %2 = arith.minsi %1, %c1_i32_0 : i32
    %c0_i32 = arith.constant 0 : i32
    %c0_i32_1 = arith.constant 0 : i32
    return %2, %c0_i32 : i32, i32
  }
  func.func @transform_1(%arg0: i32, %arg1: i32) -> (i32, i32) {
    %c1_i32 = arith.constant 1 : i32
    %0 = arith.muli %arg0, %c1_i32 : i32
    %1 = arith.addi %0, %arg1 : i32
    %c1_i32_0 = arith.constant 1 : i32
    %2 = arith.minsi %1, %c1_i32_0 : i32
    %c0_i32 = arith.constant 0 : i32
    %c0_i32_1 = arith.constant 0 : i32
    return %2, %c0_i32 : i32, i32
  }
  func.func @transform_2(%arg0: i32, %arg1: i32) -> (i32, i32, i32) {
    %c0_i32 = arith.constant 0 : i32
    %c0_i32_0 = arith.constant 0 : i32
    %c0_i32_1 = arith.constant 0 : i32
    return %arg0, %c0_i32, %c0_i32_0 : i32, i32, i32
  }
}

</mosaic_0001>

<bundles_post_ra>
// kernel: _loss.2
= control target key start
LH: loop header
LB: loop body
LE: loop exit
PB: predicated region body
PF: predicated region fallthrough
CT: control target
= control target key end

     0   :  { %7 = vsyncpa [#allocation3], 0  ;;  %s810_s0 = inlined_call_operand.hbm [shape: f32[256,128], index: 0, kind: input, shape index: {}]   ;;  %s811_s1 = inlined_call_operand.hbm [shape: f32[256,128], index: 1, kind: input, shape index: {}]   ;;  %s812_s2 = inlined_call_operand.vmem [shape: f32[2,32,128], index: 2, kind: output, shape index: {}]  }
   0x1   :  { %9 = vsyncpa [#allocation3 + $0x1], 0 }
   0x2   :  { %10 = vsyncpa [#allocation5], 0 }
   0x3   :  { %12 = vsyncpa [#allocation5 + $0x1], 0  ;;  %s656_s9 = smov 0   ;;  %s658_s10 = smov 0  }
   0x4   :  { %s660_s11 = smov 0   ;;  %s662_s12 = smov 0  }
   0x5   :  { %s664_s13 = smov 0   ;;  %s666_s14 = smov 0  }
   0x6 LB: > { %s440_s15 = sadd.s32 4294967295, %s637_s14   ;;  %s30_s16 = sadd.s32 1, %s633_s13  ;;  %s637_s14 = sphi %s666_s14, %s18_s14   ;;  %s633_s13 = sphi %s664_s13, %s820_s13   ;;  %s629_s12 = sphi %s662_s12, %s819_s12   ;;  %s625_s11 = sphi %s660_s11, %s818_s11   ;;  %s621_s10 = sphi %s658_s10, %s817_s10   ;;  %s617_s9 = sphi %s656_s9, %s816_s9  }
   0x7   : > { %p32_p0 = scmp.ge.s32.totalorder %s30_s16, 2  ;;  %p35_p1 = scmp.lt.s32.totalorder %s633_s13, 1 }
   0x8   : > { %s43_s17 = sadd.s32 1, %s625_s11  ;;  %p50_p2 = scmp.ne.s32.totalorder %s625_s11, %s621_s10 }
   0x9   : > { %s822_s16 = smov (%p32_p0, %s30_s16), 0  ;;  %p51_p4 = scmp.eq.s32.totalorder %s637_s14, 0 }
   0xa   : > { %s693_s18 = scalar_select %p35_p1, %s633_s13, 1 }
   0xb   : > { %p38_p3 = scmp.lt.s32.totalorder %s822_s16, 1  ;;  %p56_p5 = scmp.ne.s32.totalorder %s621_s10, %s617_s9 }
   0xc   : > { %p57_p6 = scmp.eq.s32.totalorder %s440_s15, 0  ;;  %p699_p7 = por %p51_p4, %p50_p2 }
   0xd   : > { %s39_s19 = scalar_select %p38_p3, %s822_s16, 1 }
   0xe   : > { %p703_p8 = por %p57_p6, %p56_p5  ;;  %p471_p10 = scmp.lt.s32.totalorder %s637_s14, 2 }
   0xf   : > { %s40_s22 = ssub.s32 %s693_s18, %s39_s19  ;;  %s710_s23 = sand.u32 1, %s625_s11  }
  0x10   : > { %p41_p9 = scmp.eq.s32.totalorder %s40_s22, 0  ;;  %s457_s24 = sshll.u32 %s693_s18, 7 }
  0x11   : > { %s444_s26 = sshll.u32 %s710_s23, 7  ;;  %s150_s29 = scalar_lea.hbm %s810_s0, %s457_s24 }
  0x12   : > { %s714_s25 = scalar_select %p41_p9, %s625_s11, %s43_s17  }
  0x13   : > { %s151_s30 = sshll.u32 %s150_s29, 4  ;;  %s142_s3 = scalar_lea.vmem [#allocation2], %s444_s26  ;;  %s152_s30 = int_to_ptr.hbm [resolvable:$true] %s151_s30 }
  0x14   : > { %s153_s4 = sshll.u32 %s142_s3, 4  ;;  %p722_p11 = pnand %p471_p10, %p699_p7  ;;  %s154_s4 = int_to_ptr.vmem [resolvable:$true] %s153_s4 }
  0x15   : > { %p450_p12 = scmp.ge.s32.totalorder %s637_s14, 1  ;;  %p186_p13 = scmp.lt.s32.totalorder %s637_s14, 3 }
  0x16   : > { %s139_s6 = scalar_lea.sflag [#allocation3], %s710_s23  ;;  %s639_s7 = smov 128  }
  0x17   : > { %s640_s8 = smov 8   ;;  %p187_p0 = pnand %p450_p12, %p186_p13 }
  0x18   : > { %467 = dma.hbm_to_vmem [thread:$0]  (!%p722_p11), %s152_s30, 2048, %s154_s4, %s139_s6, %s639_s7, %s639_s7, %s640_s8  }
  0x19   : > { %s175_s17 = scalar_lea.hbm %s811_s1, %s457_s24  ;;  %s167_s19 = scalar_lea.vmem [#allocation4], %s444_s26 }
  0x1a   : > { %s176_s18 = sshll.u32 %s175_s17, 4  ;;  %s178_s20 = sshll.u32 %s167_s19, 4  ;;  %s177_s18 = int_to_ptr.hbm [resolvable:$true] %s176_s18  ;;  %s179_s20 = int_to_ptr.vmem [resolvable:$true] %s178_s20 }
  0x1b   : > { %s164_s22 = scalar_lea.sflag [#allocation5], %s710_s23  ;;  %190 = sbr.rel (%p187_p0) target bundleno = 60 (0x3c), region = 28 }
  0x1c   : > { %470 = dma.hbm_to_vmem [thread:$0]  (!%p722_p11), %s177_s18, 2048, %s179_s20, %s164_s22, %s639_s7, %s639_s7, %s640_s8  }
  0x1d   : > { %s192_s27 = sand.u32 (!%p187_p0), 1, %s621_s10  }
  0x1e   : > { %s451_s28 = sshll.u32 (!%p187_p0), %s192_s27, 7  ;;  %s193_s29 = scalar_lea.sflag (!%p187_p0), [#allocation3], %s192_s27 }
  0x1f   : > { %s738_s30 = scalar_lea.vmem (!%p187_p0), [#allocation2], %s451_s28 }
  0x20   : > { %608 = dma.done.wait (%p703_p8), %s193_s29, 2048  }
  0x21   : > { %610 = vsyncadd (%p703_p8), %s193_s29, 4294965248  ;;  %s203_s24 = scalar_lea.sflag [#allocation5], %s192_s27  ;;  %s744_s26 = scalar_lea.vmem [#allocation4], %s451_s28 }
  0x22   : > { %612 = dma.done.wait (%p703_p8), %s203_s24, 2048  }
  0x23   : > { %614 = vsyncadd (%p703_p8), %s203_s24, 4294965248  ;;  %p241_p1 = scmp.lt.s32.totalorder %s629_s12, 1  ;;  %v254_v0 = vld [vmem:[%s738_s30] sm:$0xff]  ;;  %v255_v10 = vld [vmem:[%s738_s30 + $0x8] sm:$0xff] }
  0x24   : > { %v258_v1 = vld [vmem:[%s738_s30 + $0x20] sm:$0xff]  ;;  %v259_v13 = vld [vmem:[%s738_s30 + $0x28] sm:$0xff]  ;;  %v256_v25 = vld [vmem:[%s738_s30 + $0x10] sm:$0xff] }
  0x25   : > { %v262_v2 = vld [vmem:[%s738_s30 + $0x40] sm:$0xff]  ;;  %v263_v14 = vld [vmem:[%s738_s30 + $0x48] sm:$0xff]  ;;  %s824_s12 = smov (!%p241_p1, %s629_s12), 1  ;;  %v260_v26 = vld [vmem:[%s738_s30 + $0x30] sm:$0xff] }
  0x26   : > { %v266_v3 = vld [vmem:[%s738_s30 + $0x60] sm:$0xff]  ;;  %v267_v15 = vld [vmem:[%s738_s30 + $0x68] sm:$0xff]  ;;  %v264_v31 = vld [vmem:[%s738_s30 + $0x50] sm:$0xff]  ;;  %s459_s21 = sshll.u32 %s824_s12, 5 }
  0x27   : > { %v270_v4 = vld [vmem:[%s744_s26] sm:$0xff]  ;;  %v271_v18 = vld [vmem:[%s744_s26 + $0x8] sm:$0xff]  ;;  %v268_v32 = vld [vmem:[%s738_s30 + $0x70] sm:$0xff]  ;;  %s245_s3 = scalar_lea.vmem %s812_s2, %s459_s21 }
  0x28   : > { %v274_v5 = vld [vmem:[%s744_s26 + $0x20] sm:$0xff]  ;;  %v286_v8 = vsub.f32 %v254_v0, %v270_v4  ;;  %v275_v19 = vld [vmem:[%s744_s26 + $0x28] sm:$0xff]  ;;  %v287_v23 = vsub.f32 %v255_v10, %v271_v18  ;;  %v272_v33 = vld [vmem:[%s744_s26 + $0x10] sm:$0xff] }
  0x29   : > { %v278_v6 = vld [vmem:[%s744_s26 + $0x40] sm:$0xff]  ;;  %v290_v9 = vsub.f32 %v258_v1, %v274_v5  ;;  %v279_v20 = vld [vmem:[%s744_s26 + $0x48] sm:$0xff]  ;;  %v291_v24 = vsub.f32 %v259_v13, %v275_v19  ;;  %v276_v36 = vld [vmem:[%s744_s26 + $0x30] sm:$0xff]  ;;  %v288_v39 = vsub.f32 %v256_v25, %v272_v33 }
  0x2a   : > { %v282_v7 = vld [vmem:[%s744_s26 + $0x60] sm:$0xff]  ;;  %v294_v11 = vsub.f32 %v262_v2, %v278_v6  ;;  %v302_v16 = vmul.f32 %v286_v8, %v286_v8  ;;  %v283_v22 = vld [vmem:[%s744_s26 + $0x68] sm:$0xff]  ;;  %v295_v29 = vsub.f32 %v263_v14, %v279_v20  ;;  %v303_v34 = vmul.f32 %v287_v23, %v287_v23  ;;  %v280_v37 = vld [vmem:[%s744_s26 + $0x50] sm:$0xff] }
  0x2b   : > { %v298_v12 = vsub.f32 %v266_v3, %v282_v7  ;;  %v306_v17 = vmul.f32 %v290_v9, %v290_v9  ;;  %v299_v30 = vsub.f32 %v267_v15, %v283_v22  ;;  %v307_v35 = vmul.f32 %v291_v24, %v291_v24  ;;  %v284_v38 = vld [vmem:[%s744_s26 + $0x70] sm:$0xff]  ;;  %v257_v44 = vld [vmem:[%s738_s30 + $0x18] sm:$0xff] }
  0x2c   : > { %v310_v21 = vmul.f32 %v294_v11, %v294_v11  ;;  %v311_v41 = vmul.f32 %v295_v29, %v295_v29  ;;  %v292_v43 = vsub.f32 %v260_v26, %v276_v36  ;;  %v261_v45 = vld [vmem:[%s738_s30 + $0x38] sm:$0xff]  ;;  %v296_v48 = vsub.f32 %v264_v31, %v280_v37 }
  0x2d   : > { %v314_v27 = vmul.f32 %v298_v12, %v298_v12  ;;  %v322_v28 = vadd.f32 %v306_v17, %v302_v16  ;;  %v315_v42 = vmul.f32 %v299_v30, %v299_v30  ;;  %v265_v46 = vld [vmem:[%s738_s30 + $0x58] sm:$0xff]  ;;  %v325_v47 = vadd.f32 %v307_v35, %v303_v34 }
  0x2e   : > { %v300_v49 = vsub.f32 %v268_v32, %v284_v38  ;;  %v304_v50 = vmul.f32 %v288_v39, %v288_v39  ;;  %v269_v51 = vld [vmem:[%s738_s30 + $0x78] sm:$0xff]  ;;  %v308_v55 = vmul.f32 %v292_v43, %v292_v43  ;;  %v312_v61 = vmul.f32 %v296_v48, %v296_v48 }
  0x2f   : > { %v323_v40 = vadd.f32 %v322_v28, %v310_v21  ;;  %v273_v52 = vld [vmem:[%s744_s26 + $0x18] sm:$0xff]  ;;  %v326_v60 = vadd.f32 %v325_v47, %v311_v41 }
  0x30   : > { %v277_v53 = vld [vmem:[%s744_s26 + $0x38] sm:$0xff]  ;;  %v289_v58 = vsub.f32 %v257_v44, %v273_v52  ;;  %v316_v62 = vmul.f32 %v300_v49, %v300_v49  ;;  %v328_v0 = vadd.f32 %v308_v55, %v304_v50 }
  0x31   : > { %v324_v54 = vadd.f32 %v323_v40, %v314_v27  ;;  %v281_v56 = vld [vmem:[%s744_s26 + $0x58] sm:$0xff]  ;;  %v293_v59 = vsub.f32 %v261_v45, %v277_v53  ;;  %v327_v3 = vadd.f32 %v326_v60, %v315_v42 }
  0x32   : > { %v285_v57 = vld [vmem:[%s744_s26 + $0x78] sm:$0xff]  ;;  %v297_v63 = vsub.f32 %v265_v46, %v281_v56  ;;  %v305_v2 = vmul.f32 %v289_v58, %v289_v58  ;;  %v329_v6 = vadd.f32 %v328_v0, %v312_v61 }
  0x33   : > { %v301_v1 = vsub.f32 %v269_v51, %v285_v57  ;;  %v309_v4 = vmul.f32 %v293_v59, %v293_v59  ;;  %338 = vst [vmem:[%s245_s3] sm:$0xff] %v324_v54 }
  0x34   : > { %v313_v5 = vmul.f32 %v297_v63, %v297_v63  ;;  %v330_v9 = vadd.f32 %v329_v6, %v316_v62  ;;  %339 = vst [vmem:[%s245_s3 + $0x8] sm:$0xff] %v327_v3 }
  0x35   : > { %v317_v7 = vmul.f32 %v301_v1, %v301_v1  ;;  %v331_v8 = vadd.f32 %v309_v4, %v305_v2 }
  0x36   : > { %340 = vst [vmem:[%s245_s3 + $0x10] sm:$0xff] %v330_v9 }
  0x37   : > { %v332_v10 = vadd.f32 %v331_v8, %v313_v5 }
  0x39   : > { %v333_v11 = vadd.f32 %v332_v10, %v317_v7 }
  0x3b   : > { %341 = vst [vmem:[%s245_s3 + $0x18] sm:$0xff] %v333_v11 }
  0x3c PF: > { %s18_s14 = sadd.s32 1, %s637_s14   ;;  %s816_s9 = smov %s621_s10 }
  0x3d   : > { %p15_p2 = scmp.ge.s32.totalorder %s18_s14, 4   ;;  %s817_s10 = smov %s625_s11 }
  0x3e   : > { %s818_s11 = smov %s714_s25  ;;  %s819_s12 = smov %s633_s13 }
  0x3f   : > { %s820_s13 = smov %s822_s16  ;;  %17 = sbr.rel (!%p15_p2) target bundleno = 6 (0x6), region = 85 }
  0x44   :  { %363 = vsyncpa [#allocation3], 1 }
  0x45   :  { %365 = vsyncpa [#allocation3 + $0x1], 1 }
  0x46   :  { %366 = vsyncpa [#allocation5], 1 }
  0x47   :  { %368 = vsyncpa [#allocation5 + $0x1], 1 }

// kernel: _loss.3
= control target key start
LH: loop header
LB: loop body
LE: loop exit
PB: predicated region body
PF: predicated region fallthrough
CT: control target
= control target key end

     0   :  { %s856_s12 = smov 0   ;;  %s858_s13 = smov 0   ;;  %s1090_s0 = inlined_call_operand.vmem [shape: f32[512,128], index: 0, kind: input, shape index: {}]   ;;  %s1091_s1 = inlined_call_operand.vmem [shape: f32[512,128], index: 1, kind: input, shape index: {}]   ;;  %s1092_s2 = inlined_call_operand.vmem [shape: f32[16,32], index: 2, kind: input, shape index: {}]   ;;  %s1093_s3 = inlined_call_operand.vmem [shape: f32[2,32,128], index: 3, kind: output, shape index: {}]  }
   0x1   :  { %s860_s14 = smov 0  }
   0x2 LB: > { %s25_s15 = sadd.s32 1, %s830_s13  ;;  %p745_p0 = scmp.ge.s32.totalorder %s834_s14, 1  ;;  %s834_s14 = sphi %s860_s14, %s13_s14   ;;  %s830_s13 = sphi %s858_s13, %s1095_s13   ;;  %s826_s12 = sphi %s856_s12, %s1094_s12  }
   0x3   : > { %p27_p1 = scmp.ge.s32.totalorder %s25_s15, 2  ;;  %p182_p2 = scmp.lt.s32.totalorder %s834_s14, 3 }
   0x5   : > { %s1097_s15 = smov (%p27_p1, %s25_s15), 0  ;;  %p183_p3 = pnand %p745_p0, %p182_p2 }
   0x6   : > { %p235_p4 = scmp.lt.s32.totalorder (!%p183_p3), %s826_s12, 1  ;;  %s746_s21 = sshll.u32 (!%p183_p3), %s826_s12, 5 }
   0x7   : > { %186 = sbr.rel (%p183_p3) target bundleno = 338 (0x152), region = 32  ;;  %p220_p5 = scmp.lt.s32.totalorder (!%p183_p3), %s746_s21, 63 }
   0xc   : > { %v387_v0 = vlaneseq  ;;  %s880_s16 = scalar_select %p235_p4, %s826_s12, 1 }
   0xd   : > { %s1099_s21 = smov (!%p220_p5, %s746_s21), 63 }
   0xe   : > { %v877_v1 = vshrl.u32 %v387_v0, 7  ;;  %s750_s17 = sshll.u32 %s880_s16, 3  ;;  %s747_s22 = sshll.u32 %s1099_s21, 3 }
   0xf   : > { %s238_s20 = scalar_lea.vmem %s1092_s2, %s750_s17  ;;  %s934_s25 = scalar_lea.vmem %s1090_s0, %s747_s22 }
  0x10   : > { %782 = vset.pattern.permute.xlu2 %v877_v1  ;;  %v884_v2 = vadd.s32 16, %v877_v1  ;;  %781 = vset.pattern.permute.xlu0 %v877_v1  ;;  %v892_v3 = vld [vmem:[%s238_s20] sm:$0xff]  ;;  %v897_v6 = vadd.s32 8, %v877_v1  ;;  %v901_v8 = vadd.s32 24, %v877_v1  ;;  %s939_s28 = scalar_lea.vmem %s1091_s1, %s747_s22  ;;  %v260_v15 = vld [vmem:[%s934_s25 + $0x38] sm:$0xff]  ;;  %v258_v31 = vld [vmem:[%s934_s25 + $0x28] sm:$0xff] }
  0x11   : > { %v411_v4 = vperm.slane %v892_v3, 1  ;;  %v386_v5 = vperm.slane %v892_v3, 0  ;;  %v436_v7 = vperm.slane %v892_v3, 2  ;;  %v461_v9 = vperm.slane %v892_v3, 3  ;;  %v292_v16 = vld [vmem:[%s939_s28 + $0x38] sm:$0xff]  ;;  %v290_v32 = vld [vmem:[%s939_s28 + $0x28] sm:$0xff] }
  0x12   : > { %783 = vset.pattern.permute.xlu1 %v884_v2  ;;  %v486_v10 = vperm.slane %v892_v3, 4  ;;  %v511_v11 = vperm.slane %v892_v3, 5  ;;  %v928_v13 = vperm.slane %v892_v3, 7  ;;  %v256_v17 = vld [vmem:[%s934_s25 + $0x18] sm:$0xff]  ;;  %v324_v19 = vsub.f32 %v260_v15, %v292_v16  ;;  %v254_v34 = vld [vmem:[%s934_s25 + $0x8] sm:$0xff]  ;;  %s755_s29 = sshll.u32 %s880_s16, 5 }
  0x13   : > { %v288_v18 = vld [vmem:[%s939_s28 + $0x18] sm:$0xff]  ;;  %v536_v30 = vperm.slane %v892_v3, 6  ;;  %v286_v35 = vld [vmem:[%s939_s28 + $0x8] sm:$0xff]  ;;  %v322_v36 = vsub.f32 %v258_v31, %v290_v32  ;;  %s1040_s5 = scalar_lea.vmem %s1093_s3, %s755_s29 }
  0x14   : > { %v320_v21 = vsub.f32 %v256_v17, %v288_v18  ;;  %v356_v22 = vmul.f32 %v324_v19, %v324_v19  ;;  %v318_v37 = vsub.f32 %v254_v34, %v286_v35  ;;  %v262_v38 = vld [vmem:[%s934_s25 + $0x48] sm:$0xff]  ;;  %v268_v53 = vld [vmem:[%s934_s25 + $0x78] sm:$0xff]  ;;  %v293_v17 = vld [vmem:[%s939_s28 + $0x40] sm:$0xff] }
  0x15   : > { %v294_v39 = vld [vmem:[%s939_s28 + $0x48] sm:$0xff]  ;;  %v354_v41 = vmul.f32 %v322_v36, %v322_v36  ;;  %v300_v54 = vld [vmem:[%s939_s28 + $0x78] sm:$0xff]  ;;  %v273_v35 = vld [vmem:[%s934_s25 + $0xa0] sm:$0xff] }
  0x16   : > { %v352_v24 = vmul.f32 %v320_v21, %v320_v21  ;;  %v350_v42 = vmul.f32 %v318_v37, %v318_v37  ;;  %v326_v43 = vsub.f32 %v262_v38, %v294_v39  ;;  %v264_v55 = vld [vmem:[%s934_s25 + $0x58] sm:$0xff]  ;;  %v332_v58 = vsub.f32 %v268_v53, %v300_v54  ;;  %v305_v36 = vld [vmem:[%s939_s28 + $0xa0] sm:$0xff]  ;;  %v287_v53 = vld [vmem:[%s939_s28 + $0x10] sm:$0xff] }
  0x17   : > { %v296_v56 = vld [vmem:[%s939_s28 + $0x58] sm:$0xff] }
  0x18   : > { %416 = vperm.xlu2 %782, %v411_v4   ;;  %391 = vperm.xlu0 %781, %v386_v5   ;;  %v358_v47 = vmul.f32 %v326_v43, %v326_v43  ;;  %v328_v59 = vsub.f32 %v264_v55, %v296_v56  ;;  %v364_v60 = vmul.f32 %v332_v58, %v332_v58  ;;  %v263_v56 = vld [vmem:[%s934_s25 + $0x50] sm:$0xff] }
  0x19   : > { %v295_v58 = vld [vmem:[%s939_s28 + $0x50] sm:$0xff] }
  0x1a   : > { %403 = vperm.xlu1 %783, %v386_v5   ;;  %v360_v61 = vmul.f32 %v328_v59, %v328_v59 }
  0x20   : > { %785 = vset.pattern.permute.xlu2 %v897_v6  ;;  %441 = vperm.xlu0 %781, %v436_v7  }
  0x22   : > { %784 = vset.pattern.permute.xlu1 %v901_v8 }
  0x28   : > { %422 = vperm.xlu2 %785, %v411_v4   ;;  %788 = vset.pattern.permute.xlu0 %v897_v6 }
  0x2a   : > { %409 = vperm.xlu1 %784, %v386_v5  }
  0x30   : > { %787 = vset.pattern.permute.xlu2 %v901_v8  ;;  %397 = vperm.xlu0 %788, %v386_v5  }
  0x32   : > { %786 = vset.pattern.permute.xlu1 %v884_v2 }
  0x38   : > { %434 = vperm.xlu2 %787, %v411_v4   ;;  %472 = vperm.xlu0 %788, %v461_v9  }
  0x3a   : > { %428 = vperm.xlu1 %786, %v411_v4  }
  0x40   : > { %790 = vset.pattern.permute.xlu2 %v884_v2  ;;  %797 = vset.pattern.permute.xlu0 %v884_v2 }
  0x42   : > { %789 = vset.pattern.permute.xlu1 %v897_v6 }
  0x48   : > { %453 = vperm.xlu2 %790, %v436_v7   ;;  %503 = vperm.xlu0 %797, %v486_v10  }
  0x4a   : > { %447 = vperm.xlu1 %789, %v436_v7  }
  0x50   : > { %792 = vset.pattern.permute.xlu2 %v877_v1  ;;  %802 = vset.pattern.permute.xlu0 %v901_v8 }
  0x52   : > { %791 = vset.pattern.permute.xlu1 %v901_v8 }
  0x58   : > { %466 = vperm.xlu2 %792, %v461_v9   ;;  %534 = vperm.xlu0 %802, %v511_v11  }
  0x5a   : > { %459 = vperm.xlu1 %791, %v436_v7   ;;  %v289_v7 = vld [vmem:[%s939_s28 + $0x20] sm:$0xff] }
  0x60   : > { %794 = vset.pattern.permute.xlu2 %v901_v8  ;;  %807 = vset.pattern.permute.xlu0 %v877_v1 }
  0x62   : > { %793 = vset.pattern.permute.xlu1 %v884_v2 }
  0x68   : > { %484 = vperm.xlu2 %794, %v461_v9   ;;  %566 = vperm.xlu0 %807, %v928_v13  }
  0x6a   : > { %478 = vperm.xlu1 %793, %v461_v9   ;;  %v253_v9 = vld [vmem:[%s934_s25] sm:$0xff] }
  0x70   : > { %796 = vset.pattern.permute.xlu2 %v897_v6  ;;  %811 = vset.pattern.permute.xlu0 %v901_v8 }
  0x72   : > { %795 = vset.pattern.permute.xlu1 %v877_v1  ;;  %v925_v12 = vpop.permute.xlu2 %416 }
  0x78   : > { %497 = vperm.xlu2 %796, %v486_v10  }
  0x7a   : > { %491 = vperm.xlu1 %795, %v486_v10  }
  0x80   : > { %799 = vset.pattern.permute.xlu2 %v877_v1 }
  0x82   : > { %798 = vset.pattern.permute.xlu1 %v901_v8  ;;  %v423_v14 = vpop.permute.xlu2 %422 }
  0x83   : > { %v591_v45 = vmul.f32 %v423_v14, %v354_v41 }
  0x88   : > { %516 = vperm.xlu2 %799, %v511_v11  }
  0x8a   : > { %509 = vperm.xlu1 %798, %v486_v10   ;;  %v952_v29 = vpop.permute.xlu0 %391  ;;  %v285_v10 = vld [vmem:[%s939_s28] sm:$0xff] }
  0x8b   : > { %v317_v15 = vsub.f32 %v253_v9, %v285_v10 }
  0x8c   : > { %v947_v20 = vpop.permute.xlu1 %403 }
  0x8d   : > { %v349_v19 = vmul.f32 %v317_v15, %v317_v15 }
  0x90   : > { %801 = vset.pattern.permute.xlu2 %v884_v2 }
  0x92   : > { %800 = vset.pattern.permute.xlu1 %v897_v6  ;;  %v435_v23 = vpop.permute.xlu2 %434  ;;  %v957_v33 = vpop.permute.xlu0 %441 }
  0x93   : > { %v593_v25 = vmul.f32 %v435_v23, %v356_v22  ;;  %v265_v22 = vld [vmem:[%s934_s25 + $0x60] sm:$0xff] }
  0x94   : > { %v297_v23 = vld [vmem:[%s939_s28 + $0x60] sm:$0xff] }
  0x98   : > { %528 = vperm.xlu2 %801, %v511_v11  }
  0x9a   : > { %522 = vperm.xlu1 %800, %v511_v11  }
  0x9c   : > { %v410_v26 = vpop.permute.xlu1 %409 }
  0x9d   : > { %v589_v27 = vmul.f32 %v410_v26, %v352_v24  ;;  %v301_v26 = vld [vmem:[%s939_s28 + $0x80] sm:$0xff] }
  0x9f   : > { %v639_v28 = vadd.f32 %v593_v25, %v589_v27  ;;  %v269_v25 = vld [vmem:[%s934_s25 + $0x80] sm:$0xff]  ;;  %v329_v27 = vsub.f32 %v265_v22, %v297_v23 }
  0xa0   : > { %804 = vset.pattern.permute.xlu2 %v897_v6  ;;  %v333_v34 = vsub.f32 %v269_v25, %v301_v26 }
  0xa1   : > { %v361_v37 = vmul.f32 %v329_v27, %v329_v27 }
  0xa2   : > { %803 = vset.pattern.permute.xlu1 %v877_v1  ;;  %v398_v44 = vpop.permute.xlu0 %397  ;;  %v967_v48 = vpop.permute.xlu2 %453  ;;  %v365_v43 = vmul.f32 %v333_v34, %v333_v34 }
  0xa3   : > { %v587_v46 = vmul.f32 %v398_v44, %v350_v42  ;;  %v337_v42 = vsub.f32 %v273_v35, %v305_v36  ;;  %v277_v44 = vld [vmem:[%s934_s25 + $0xc0] sm:$0xff] }
  0xa5   : > { %v625_v50 = vadd.f32 %v591_v45, %v587_v46  ;;  %v309_v46 = vld [vmem:[%s939_s28 + $0xc0] sm:$0xff]  ;;  %v369_v59 = vmul.f32 %v337_v42, %v337_v42  ;;  %v315_v42 = vld [vmem:[%s939_s28 + $0xf0] sm:$0xff] }
  0xa8   : > { %547 = vperm.xlu2 %804, %v536_v30  }
  0xaa   : > { %541 = vperm.xlu1 %803, %v536_v30   ;;  %v991_v11 = vpop.permute.xlu0 %472 }
  0xac   : > { %v965_v40 = vpop.permute.xlu1 %428 }
  0xb0   : > { %806 = vset.pattern.permute.xlu2 %v901_v8 }
  0xb2   : > { %805 = vset.pattern.permute.xlu1 %v884_v2  ;;  %v467_v57 = vpop.permute.xlu2 %466 }
  0xb8   : > { %559 = vperm.xlu2 %806, %v536_v30  }
  0xba   : > { %553 = vperm.xlu1 %805, %v536_v30   ;;  %v997_v24 = vpop.permute.xlu0 %503  ;;  %v586_v30 = vmul.f32 %v952_v29, %v349_v19  ;;  %v291_v29 = vld [vmem:[%s939_s28 + $0x30] sm:$0xff] }
  0xbb   : > { %v271_v19 = vld [vmem:[%s934_s25 + $0x90] sm:$0xff] }
  0xbc   : > { %v448_v49 = vpop.permute.xlu1 %447 }
  0xbd   : > { %v595_v51 = vmul.f32 %v448_v49, %v358_v47  ;;  %v281_v47 = vld [vmem:[%s934_s25 + $0xe0] sm:$0xff] }
  0xbe   : > { %v313_v49 = vld [vmem:[%s939_s28 + $0xe0] sm:$0xff] }
  0xbf   : > { %v969_v52 = vadd.f32 %v625_v50, %v595_v51  ;;  %v598_v50 = vmul.f32 %v467_v57, %v361_v37  ;;  %v255_v51 = vld [vmem:[%s934_s25 + $0x10] sm:$0xff] }
  0xc0   : > { %809 = vset.pattern.permute.xlu2 %v884_v2 }
  0xc2   : > { %808 = vset.pattern.permute.xlu1 %v897_v6  ;;  %v485_v62 = vpop.permute.xlu2 %484  ;;  %v257_v6 = vld [vmem:[%s934_s25 + $0x20] sm:$0xff] }
  0xc3   : > { %v601_v0 = vmul.f32 %v485_v62, %v364_v60  ;;  %v321_v14 = vsub.f32 %v257_v6, %v289_v7  ;;  %v345_v62 = vsub.f32 %v281_v47, %v313_v49  ;;  %v299_v6 = vld [vmem:[%s939_s28 + $0x70] sm:$0xff] }
  0xc5   : > { %v353_v18 = vmul.f32 %v321_v14, %v321_v14  ;;  %v377_v15 = vmul.f32 %v345_v62, %v345_v62  ;;  %v306_v62 = vld [vmem:[%s939_s28 + $0xa8] sm:$0xff] }
  0xc8   : > { %578 = vperm.xlu2 %809, %v928_v13  }
  0xca   : > { %572 = vperm.xlu1 %808, %v928_v13   ;;  %v1013_v45 = vpop.permute.xlu0 %534 }
  0xcc   : > { %v460_v63 = vpop.permute.xlu1 %459 }
  0xcd   : > { %v597_v1 = vmul.f32 %v460_v63, %v360_v61  ;;  %v341_v61 = vsub.f32 %v277_v44, %v309_v46  ;;  %v319_v63 = vsub.f32 %v255_v51, %v287_v53  ;;  %v266_v44 = vld [vmem:[%s934_s25 + $0x68] sm:$0xff] }
  0xce   : > { %v298_v46 = vld [vmem:[%s939_s28 + $0x68] sm:$0xff] }
  0xcf   : > { %v640_v2 = vadd.f32 %v639_v28, %v597_v1  ;;  %v590_v28 = vmul.f32 %v925_v12, %v353_v18  ;;  %v259_v12 = vld [vmem:[%s934_s25 + $0x30] sm:$0xff]  ;;  %v327_v1 = vsub.f32 %v263_v56, %v295_v58  ;;  %v373_v14 = vmul.f32 %v341_v61, %v341_v61  ;;  %v270_v56 = vld [vmem:[%s934_s25 + $0x88] sm:$0xff] }
  0xd0   : > { %v323_v54 = vsub.f32 %v259_v12, %v291_v29  ;;  %v283_v29 = vld [vmem:[%s934_s25 + $0xf0] sm:$0xff]  ;;  %v302_v58 = vld [vmem:[%s939_s28 + $0x88] sm:$0xff] }
  0xd1   : > { %v979_v3 = vadd.f32 %v640_v2, %v601_v0  ;;  %v618_v38 = vadd.f32 %v590_v28, %v586_v30  ;;  %v267_v2 = vld [vmem:[%s934_s25 + $0x70] sm:$0xff]  ;;  %v359_v18 = vmul.f32 %v327_v1, %v327_v1  ;;  %v347_v51 = vsub.f32 %v283_v29, %v315_v42  ;;  %v274_v61 = vld [vmem:[%s934_s25 + $0xa8] sm:$0xff] }
  0xd2   : > { %810 = vset.pattern.permute.xlu1 %v901_v8  ;;  %v985_v5 = vpop.permute.xlu2 %497  ;;  %v261_v8 = vld [vmem:[%s934_s25 + $0x40] sm:$0xff]  ;;  %v355_v57 = vmul.f32 %v323_v54, %v323_v54  ;;  %v307_v28 = vld [vmem:[%s939_s28 + $0xb0] sm:$0xff]  ;;  %v330_v54 = vsub.f32 %v266_v44, %v298_v46  ;;  %v316_v44 = vld [vmem:[%s939_s28 + $0xf8] sm:$0xff] }
  0xd3   : > { %v325_v21 = vsub.f32 %v261_v8, %v293_v17  ;;  %v351_v8 = vmul.f32 %v319_v63, %v319_v63  ;;  %v331_v17 = vsub.f32 %v267_v2, %v299_v6  ;;  %v596_v36 = vmul.f32 %v967_v48, %v359_v18 }
  0xd4   : > { %v592_v23 = vmul.f32 %v965_v40, %v355_v57  ;;  %v362_v57 = vmul.f32 %v330_v54, %v330_v54 }
  0xd5   : > { %v357_v31 = vmul.f32 %v325_v21, %v325_v21  ;;  %v303_v21 = vld [vmem:[%s939_s28 + $0x90] sm:$0xff]  ;;  %v588_v30 = vmul.f32 %v947_v20, %v351_v8 }
  0xd6   : > { %v335_v34 = vsub.f32 %v271_v19, %v303_v21  ;;  %v311_v20 = vld [vmem:[%s939_s28 + $0xd0] sm:$0xff]  ;;  %v599_v8 = vmul.f32 %v991_v11, %v362_v57  ;;  %v282_v21 = vld [vmem:[%s934_s25 + $0xe8] sm:$0xff]  ;;  %v272_v11 = vld [vmem:[%s934_s25 + $0x98] sm:$0xff] }
  0xd7   : > { %v594_v39 = vmul.f32 %v957_v33, %v357_v31  ;;  %v363_v31 = vmul.f32 %v331_v17, %v331_v17  ;;  %v632_v37 = vadd.f32 %v592_v23, %v588_v30  ;;  %v304_v30 = vld [vmem:[%s939_s28 + $0x98] sm:$0xff] }
  0xd8   : > { %v367_v48 = vmul.f32 %v335_v34, %v335_v34 }
  0xd9   : > { %v619_v33 = vadd.f32 %v618_v38, %v594_v39  ;;  %v279_v39 = vld [vmem:[%s934_s25 + $0xd0] sm:$0xff]  ;;  %v633_v47 = vadd.f32 %v632_v37, %v596_v36  ;;  %v336_v36 = vsub.f32 %v272_v11, %v304_v30 }
  0xda   : > { %584 = vperm.xlu1 %810, %v928_v13  }
  0xdb   : > { %v620_v0 = vadd.f32 %v619_v33, %v598_v50  ;;  %v343_v50 = vsub.f32 %v279_v39, %v311_v20  ;;  %v604_v33 = vmul.f32 %v997_v24, %v367_v48  ;;  %v338_v24 = vsub.f32 %v274_v61, %v306_v62  ;;  %v312_v39 = vld [vmem:[%s939_s28 + $0xd8] sm:$0xff] }
  0xdc   : > { %v983_v4 = vpop.permute.xlu1 %478  ;;  %v368_v20 = vmul.f32 %v336_v36, %v336_v36  ;;  %v284_v48 = vld [vmem:[%s934_s25 + $0xf8] sm:$0xff] }
  0xdd   : > { %v370_v18 = vmul.f32 %v338_v24, %v338_v24 }
  0xe2   : > { %v517_v13 = vpop.permute.xlu2 %516 }
  0xe3   : > { %v606_v9 = vmul.f32 %v517_v13, %v369_v59  ;;  %v275_v13 = vld [vmem:[%s934_s25 + $0xb0] sm:$0xff]  ;;  %v375_v59 = vmul.f32 %v343_v50, %v343_v50 }
  0xe4   : > { %v339_v40 = vsub.f32 %v275_v13, %v307_v28 }
  0xe6   : > { %v371_v49 = vmul.f32 %v339_v40, %v339_v40 }
  0xec   : > { %v492_v16 = vpop.permute.xlu1 %491 }
  0xed   : > { %v602_v60 = vmul.f32 %v492_v16, %v365_v43  ;;  %v567_v16 = vpop.permute.xlu0 %566  ;;  %v600_v43 = vmul.f32 %v983_v4, %v363_v31 }
  0xee   : > { %v614_v27 = vmul.f32 %v567_v16, %v377_v15  ;;  %v310_v15 = vld [vmem:[%s939_s28 + $0xc8] sm:$0xff] }
  0xef   : > { %v621_v10 = vadd.f32 %v620_v0, %v602_v60  ;;  %v634_v53 = vadd.f32 %v633_v47, %v600_v43  ;;  %v379_v60 = vmul.f32 %v347_v51, %v347_v51  ;;  %v334_v0 = vsub.f32 %v270_v56, %v302_v58 }
  0xf1   : > { %v622_v26 = vadd.f32 %v621_v10, %v606_v9  ;;  %v635_v1 = vadd.f32 %v634_v53, %v604_v33 }
  0xf2   : > { %v1008_v41 = vpop.permute.xlu2 %528 }
  0xf3   : > { %v608_v4 = vmul.f32 %v1008_v41, %v371_v49  ;;  %v366_v41 = vmul.f32 %v334_v0, %v334_v0  ;;  %v348_v49 = vsub.f32 %v284_v48, %v316_v44 }
  0xf5   : > { %v636_v6 = vadd.f32 %v635_v1, %v608_v4  ;;  %v603_v23 = vmul.f32 %v985_v5, %v366_v41  ;;  %v276_v5 = vld [vmem:[%s934_s25 + $0xb8] sm:$0xff]  ;;  %v380_v33 = vmul.f32 %v348_v49, %v348_v49 }
  0xfc   : > { %v1003_v32 = vpop.permute.xlu1 %509 }
 0x102   : > { %v1026_v7 = vpop.permute.xlu2 %547 }
 0x10c   : > { %v1020_v55 = vpop.permute.xlu1 %522 }
 0x112   : > { %v1042_v12 = vpop.permute.xlu2 %559 }
 0x11c   : > { %v542_v22 = vpop.permute.xlu1 %541 }
 0x11d   : > { %v610_v25 = vmul.f32 %v542_v22, %v373_v14  ;;  %v278_v14 = vld [vmem:[%s934_s25 + $0xc8] sm:$0xff] }
 0x11e   : > { %v342_v17 = vsub.f32 %v278_v14, %v310_v15  ;;  %v314_v22 = vld [vmem:[%s939_s28 + $0xe8] sm:$0xff] }
 0x11f   : > { %v623_v35 = vadd.f32 %v622_v26, %v610_v25  ;;  %v627_v25 = vadd.f32 %v969_v52, %v599_v8  ;;  %v346_v13 = vsub.f32 %v282_v21, %v314_v22  ;;  %v308_v52 = vld [vmem:[%s939_s28 + $0xb8] sm:$0xff] }
 0x120   : > { %v374_v26 = vmul.f32 %v342_v17, %v342_v17  ;;  %v340_v29 = vsub.f32 %v276_v5, %v308_v52 }
 0x121   : > { %v624_v38 = vadd.f32 %v623_v35, %v614_v27  ;;  %v607_v27 = vmul.f32 %v1020_v55, %v370_v18  ;;  %v628_v28 = vadd.f32 %v627_v25, %v603_v23  ;;  %v378_v35 = vmul.f32 %v346_v13, %v346_v13  ;;  %v280_v55 = vld [vmem:[%s934_s25 + $0xd8] sm:$0xff] }
 0x122   : > { %v579_v63 = vpop.permute.xlu2 %578  ;;  %v611_v31 = vmul.f32 %v1026_v7, %v374_v26  ;;  %v344_v43 = vsub.f32 %v280_v55, %v312_v39  ;;  %v605_v7 = vmul.f32 %v1003_v32, %v368_v20  ;;  %v372_v46 = vmul.f32 %v340_v29, %v340_v29 }
 0x123   : > { %650 = vst [vmem:[%s1040_s5] sm:$0xff] %v624_v38  ;;  %v616_v10 = vmul.f32 %v579_v63, %v379_v60  ;;  %v629_v34 = vadd.f32 %v628_v28, %v607_v27 }
 0x124   : > { %v376_v47 = vmul.f32 %v344_v43, %v344_v43  ;;  %v642_v50 = vadd.f32 %v979_v3, %v605_v7  ;;  %v609_v51 = vmul.f32 %v1013_v45, %v372_v46 }
 0x125   : > { %v630_v38 = vadd.f32 %v629_v34, %v611_v31 }
 0x126   : > { %v613_v53 = vmul.f32 %v1042_v12, %v376_v47  ;;  %v643_v54 = vadd.f32 %v642_v50, %v609_v51 }
 0x128   : > { %v644_v58 = vadd.f32 %v643_v54, %v613_v53 }
 0x12c   : > { %v554_v2 = vpop.permute.xlu1 %553 }
 0x12d   : > { %v612_v9 = vmul.f32 %v554_v2, %v375_v59 }
 0x12f   : > { %v637_v16 = vadd.f32 %v636_v6, %v612_v9 }
 0x131   : > { %v638_v19 = vadd.f32 %v637_v16, %v616_v10 }
 0x133   : > { %652 = vst [vmem:[%s1040_s5 + $0x10] sm:$0xff] %v638_v19 }
 0x13c   : > { %v573_v37 = vpop.permute.xlu1 %572 }
 0x13d   : > { %v615_v40 = vmul.f32 %v573_v37, %v378_v35 }
 0x13f   : > { %v631_v42 = vadd.f32 %v630_v38, %v615_v40 }
 0x141   : > { %651 = vst [vmem:[%s1040_s5 + $0x8] sm:$0xff] %v631_v42 }
 0x14c   : > { %v585_v56 = vpop.permute.xlu1 %584 }
 0x14d   : > { %v617_v4 = vmul.f32 %v585_v56, %v380_v33 }
 0x14f   : > { %v645_v59 = vadd.f32 %v644_v58, %v617_v4 }
 0x151   : > { %653 = vst [vmem:[%s1040_s5 + $0x18] sm:$0xff] %v645_v59 }
 0x152 PF: > { %s13_s14 = sadd.s32 1, %s834_s14   ;;  %s1094_s12 = smov %s830_s13 }
 0x153   : > { %p10_p6 = scmp.ge.s32.totalorder %s13_s14, 4   ;;  %s1095_s13 = smov %s1097_s15 }
 0x155   :  { %12 = sbr.rel (!%p10_p6) target bundleno = 2 (0x2), region = 72 }

</bundles_post_ra>
